<compile_context>
chip_gen: v5e
topology: v5e:2x2
jax: 0.10.0
libtpu: 0.0.40
codegen_flags: <defaults>
</compile_context>

<pallas_src>
import functools
import math

import jax
import jax.numpy as jnp
from jax.experimental import pallas as pl
from jax.experimental.pallas import tpu as pltpu


def _round_up(x: int, m: int) -> int:
    return (x + m - 1) // m * m


def _mhsa_kernel(x_ref, wq_ref, wk_ref, wv_ref, wo_ref, bo_ref, o_ref, acc_ref,
                 *, seq_len, scale, compute_dtype):
    # x_ref : (S_p, H_p)      tokens of the current batch element (resident across heads)
    # wq/wk/wv_ref : (H_p, hd_p)   this head's projection slice (streamed per head)
    # wo_ref: (hd_p, H_p)     this head's output-projection rows
    # bo_ref: (1, H_p)        output bias (f32)
    # o_ref : (S_p, H_p)      output block (written once, at the last head)
    # acc_ref: (S_p, H_p) f32 accumulator over heads
    h = pl.program_id(1)

    @pl.when(h == 0)
    def _init():
        acc_ref[...] = jnp.zeros_like(acc_ref)

    x = x_ref[...]                                                     # compute_dtype
    q = jnp.dot(x, wq_ref[...], preferred_element_type=jnp.float32)    # (S_p, hd_p) f32
    k = jnp.dot(x, wk_ref[...], preferred_element_type=jnp.float32)
    v = jnp.dot(x, wv_ref[...], preferred_element_type=jnp.float32)

    # scores = q @ k^T  (contract over head_dim), f32 accumulation
    s = jax.lax.dot_general(
        q.astype(compute_dtype), k.astype(compute_dtype),
        dimension_numbers=(((1,), (1,)), ((), ())),
        preferred_element_type=jnp.float32) * scale                    # (S_p, S_p)

    s_pad = x_ref.shape[0]
    if s_pad > seq_len:  # static: only emitted when the sequence was padded
        key_pos = jax.lax.broadcasted_iota(jnp.int32, s.shape, 1)
        s = jnp.where(key_pos < seq_len, s, -1e30)

    # numerically stable softmax over keys
    s = s - jnp.max(s, axis=-1, keepdims=True)
    p = jnp.exp(s)
    p = p * pl.reciprocal(jnp.sum(p, axis=-1, keepdims=True), approx=False)

    ctx = jnp.dot(p.astype(compute_dtype), v.astype(compute_dtype),
                  preferred_element_type=jnp.float32)                  # (S_p, hd_p)

    # per-head slice of the output projection; sum over heads == concat(heads) @ Wo^T
    acc_ref[...] += jnp.dot(ctx.astype(compute_dtype), wo_ref[...],
                            preferred_element_type=jnp.float32)        # (S_p, H_p)

    @pl.when(h == pl.num_programs(1) - 1)
    def _finalize():
        # bias added to the f32 accumulator, single final cast to the output dtype
        o_ref[...] = (acc_ref[...] + bo_ref[...]).astype(o_ref.dtype)


@functools.partial(jax.jit, static_argnames=("num_heads", "use_bf16_matmul"))
def fractal_mhsa(x, wq, wk, wv, wo, bo, *, num_heads, use_bf16_matmul=False):
    """Forward pass of FractalMultiHeadSelfAttention.

    x : (B, S, H) hidden states.
    wq, wk, wv, wo : (H, H) PyTorch nn.Linear weights (out_features, in_features).
    bo : (H,) bias of to_o.  (qkv_bias=False, projection_dropout=0.0 as in the spec.)
    """
    B, S, H = x.shape
    nh = num_heads
    assert H % nh == 0, "hidden_dim must be divisible by num_heads"
    hd = H // nh
    scale = 1.0 / math.sqrt(hd)          # PyTorch SDPA default: 1/sqrt(head_dim)
    out_dtype = x.dtype

    # --- lane-dense padding: nh * hd_p is a multiple of 128, seq padded to sublane 8 ---
    pad_unit = 128 // math.gcd(nh, 128)
    hd_p = _round_up(hd, pad_unit)
    H_p = nh * hd_p
    S_p = _round_up(S, 8)

    compute_dtype = jnp.bfloat16 if use_bf16_matmul else x.dtype

    x_p = jnp.pad(x, ((0, 0), (0, S_p - S), (0, H_p - H))).astype(compute_dtype)

    def _qkv_heads(w):
        # torch layout (out, in) -> (in, out); y = x @ w.T
        w_t = jnp.pad(w.T, ((0, H_p - H), (0, 0)))            # pad input-feature axis
        w_t = w_t.reshape(H_p, nh, hd)                         # split output into heads
        w_t = jnp.pad(w_t, ((0, 0), (0, 0), (0, hd_p - hd)))   # pad head_dim
        return jnp.transpose(w_t, (1, 0, 2)).astype(compute_dtype)   # (nh, H_p, hd_p)

    wq3 = _qkv_heads(wq)
    wk3 = _qkv_heads(wk)
    wv3 = _qkv_heads(wv)

    # to_o: out = concat_h(ctx_h) @ wo.T + bo  ==  sum_h ctx_h @ wo.T[h*hd:(h+1)*hd, :]
    wo3 = wo.T.reshape(nh, hd, H)
    wo3 = jnp.pad(wo3, ((0, 0), (0, hd_p - hd), (0, H_p - H))).astype(compute_dtype)
    bo_p = jnp.pad(bo, (0, H_p - H)).reshape(1, H_p).astype(jnp.float32)

    kernel = functools.partial(_mhsa_kernel, seq_len=S, scale=scale,
                               compute_dtype=compute_dtype)

    # advisory cost estimate so XLA schedules surrounding ops sensibly
    flops = int(B * (8 * S * H * H + 4 * S * S * H))
    transcendentals = int(B * nh * S * S)
    bytes_accessed = int(
        sum(int(a.size) * a.dtype.itemsize for a in (x_p, wq3, wk3, wv3, wo3, bo_p))
        + B * S_p * H_p * jnp.dtype(out_dtype).itemsize)

    out = pl.pallas_call(
        kernel,
        out_shape=jax.ShapeDtypeStruct((B, S_p, H_p), out_dtype),
        grid_spec=pltpu.PrefetchScalarGridSpec(
            num_scalar_prefetch=0,
            grid=(B, nh),
            in_specs=[
                # tokens of batch b: constant across the head axis -> fetched once/batch
                pl.BlockSpec((None, S_p, H_p), lambda b, h: (b, 0, 0)),
                # per-head weight slices: streamed (double-buffered) along the head axis
                pl.BlockSpec((None, H_p, hd_p), lambda b, h: (h, 0, 0)),
                pl.BlockSpec((None, H_p, hd_p), lambda b, h: (h, 0, 0)),
                pl.BlockSpec((None, H_p, hd_p), lambda b, h: (h, 0, 0)),
                pl.BlockSpec((None, hd_p, H_p), lambda b, h: (h, 0, 0)),
                pl.BlockSpec((1, H_p), lambda b, h: (0, 0)),   # bias (tiny, resident)
            ],
            out_specs=pl.BlockSpec((None, S_p, H_p), lambda b, h: (b, 0, 0)),
            scratch_shapes=[pltpu.VMEM((S_p, H_p), jnp.float32)],
        ),
        compiler_params=pltpu.CompilerParams(
            dimension_semantics=("parallel", "arbitrary"),
            vmem_limit_bytes=48 * 1024 * 1024,
        ),
        cost_estimate=pl.CostEstimate(flops=flops,
                                      transcendentals=transcendentals,
                                      bytes_accessed=bytes_accessed),
    )(x_p, wq3, wk3, wv3, wo3, bo_p)

    return out[:, :S, :H]


def reference_mhsa(x, wq, wk, wv, wo, bo, *, num_heads):
    """Pure-JAX reference matching the PyTorch module (HIGHEST precision)."""
    B, S, H = x.shape
    hd = H // num_heads
    hp = jax.lax.Precision.HIGHEST
    q = jnp.einsum("bsh,oh->bso", x, wq, precision=hp)
    k = jnp.einsum("bsh,oh->bso", x, wk, precision=hp)
    v = jnp.einsum("bsh,oh->bso", x, wv, precision=hp)

    def split(t):
        return t.reshape(B, S, num_heads, hd).transpose(0, 2, 1, 3)

    q, k, v = split(q), split(k), split(v)
    s = jnp.einsum("bhqd,bhkd->bhqk", q, k, precision=hp) / math.sqrt(hd)
    p = jax.nn.softmax(s, axis=-1)
    ctx = jnp.einsum("bhqk,bhkd->bhqd", p, v, precision=hp)
    ctx = ctx.transpose(0, 2, 1, 3).reshape(B, S, H)
    return jnp.einsum("bsh,oh->bso", ctx, wo, precision=hp) + bo


if __name__ == "__main__":
    # Small shapes consistent with the module: batch=2, seq=8, hidden_dim=32, num_heads=4.
    B, S, H, NH = 2, 8, 32, 4

    key = jax.random.PRNGKey(0)
    kx, kq, kk, kv, ko, kb, kx2 = jax.random.split(key, 7)
    x = jax.random.normal(kx, (B, S, H), dtype=jnp.float32)
    wq = jax.random.normal(kq, (H, H), dtype=jnp.float32) * 0.05
    wk = jax.random.normal(kk, (H, H), dtype=jnp.float32) * 0.05
    wv = jax.random.normal(kv, (H, H), dtype=jnp.float32) * 0.05
    wo = jax.random.normal(ko, (H, H), dtype=jnp.float32) * 0.05
    bo = jax.random.normal(kb, (H,), dtype=jnp.float32) * 0.01

    # f32 path
    out = jax.block_until_ready(fractal_mhsa(x, wq, wk, wv, wo, bo, num_heads=NH))
    ref = reference_mhsa(x, wq, wk, wv, wo, bo, num_heads=NH)
    assert out.shape == (B, S, H)
    err = float(jnp.max(jnp.abs(out - ref)))
    assert jnp.allclose(out, ref, atol=5e-3, rtol=5e-3), f"f32 path max err {err}"

    # bf16 MXU path (f32 accumulation) -> looser tolerance
    out_bf = jax.block_until_ready(
        fractal_mhsa(x, wq, wk, wv, wo, bo, num_heads=NH, use_bf16_matmul=True))
    err_bf = float(jnp.max(jnp.abs(out_bf - ref)))
    assert jnp.allclose(out_bf, ref, atol=5e-2, rtol=5e-2), f"bf16 path max err {err_bf}"

    # ragged sequence length (exercises seq padding + padded-key masking)
    S2 = 10
    x2 = jax.random.normal(kx2, (B, S2, H), dtype=jnp.float32)
    out2 = jax.block_until_ready(fractal_mhsa(x2, wq, wk, wv, wo, bo, num_heads=NH))
    ref2 = reference_mhsa(x2, wq, wk, wv, wo, bo, num_heads=NH)
    err2 = float(jnp.max(jnp.abs(out2 - ref2)))
    assert jnp.allclose(out2, ref2, atol=5e-3, rtol=5e-3), f"ragged path max err {err2}"

    print("KERNEL_OK")
</pallas_src>

<mosaic_0001>
module attributes {stable_mosaic.version = 11 : i64} {
  func.func @_mhsa_kernel(%arg0: i32, %arg1: i32, %arg2: memref<1x8x128xf32, #tpu.memory_space<vmem>>, %arg3: memref<1x128x32xf32, #tpu.memory_space<vmem>>, %arg4: memref<1x128x32xf32, #tpu.memory_space<vmem>>, %arg5: memref<1x128x32xf32, #tpu.memory_space<vmem>>, %arg6: memref<1x32x128xf32, #tpu.memory_space<vmem>>, %arg7: memref<1x128xf32, #tpu.memory_space<vmem>>, %arg8: memref<1x8x128xf32, #tpu.memory_space<vmem>>, %arg9: memref<8x128xf32, #tpu.memory_space<vmem>>) attributes {dimension_semantics = [#tpu.dimension_semantics<parallel>, #tpu.dimension_semantics<arbitrary>], iteration_bounds = array<i64: 2, 4>, scalar_prefetch = 0 : i64, scratch_operands = 1 : i64, tpu.core_type = #tpu.core_type<tc>, window_params = [{transform_indices = @transform_0, window_bounds = array<i64: 1, 8, 128>}, {transform_indices = @transform_1, window_bounds = array<i64: 1, 128, 32>}, {transform_indices = @transform_2, window_bounds = array<i64: 1, 128, 32>}, {transform_indices = @transform_3, window_bounds = array<i64: 1, 128, 32>}, {transform_indices = @transform_4, window_bounds = array<i64: 1, 32, 128>}, {pipeline_mode = #tpu.pipeline_mode<synchronous>, transform_indices = @transform_5, window_bounds = array<i64: 1, 128>}, {transform_indices = @transform_6, window_bounds = array<i64: 1, 8, 128>}]} {
    %c0_i32 = arith.constant 0 : i32
    %0 = arith.cmpi eq, %arg1, %c0_i32 : i32
    %1 = arith.extui %0 : i1 to i32
    %c0_i32_0 = arith.constant 0 : i32
    %2 = arith.cmpi ne, %1, %c0_i32_0 : i32
    scf.if %2 {
      %cst_28 = arith.constant 0.000000e+00 : f32
      %37 = vector.broadcast %cst_28 : f32 to vector<8x128xf32>
      %c0_29 = arith.constant 0 : index
      %c0_30 = arith.constant 0 : index
      %38 = vector.load %arg9[%c0_29, %c0_30] : memref<8x128xf32, #tpu.memory_space<vmem>>, vector<8x128xf32>
      tpu.vector_store %arg9[%c0_29, %c0_30], %37 {strides = array<i32>} : memref<8x128xf32, #tpu.memory_space<vmem>>, vector<8x128xf32>,
    } else {
    }
    %c0 = arith.constant 0 : index
    %c0_1 = arith.constant 0 : index
    %c0_2 = arith.constant 0 : index
    %3 = vector.load %arg2[%c0, %c0_1, %c0_2] : memref<1x8x128xf32, #tpu.memory_space<vmem>>, vector<1x8x128xf32>
    %4 = vector.shape_cast %3 : vector<1x8x128xf32> to vector<8x128xf32>
    %c0_3 = arith.constant 0 : index
    %c0_4 = arith.constant 0 : index
    %c0_5 = arith.constant 0 : index
    %5 = vector.load %arg3[%c0_3, %c0_4, %c0_5] : memref<1x128x32xf32, #tpu.memory_space<vmem>>, vector<1x128x32xf32>
    %6 = vector.shape_cast %5 : vector<1x128x32xf32> to vector<128x32xf32>
    %cst = arith.constant dense<0.000000e+00> : vector<8x32xf32>
    %7 = tpu.matmul %4, %6, %cst {dimension_numbers = #tpu.dot_dimension_numbers<[1], [0], [0], [1], [0, 0, 1, 1], [], []>} : vector<8x128xf32>, vector<128x32xf32>, vector<8x32xf32> -> vector<8x32xf32>
    %c0_6 = arith.constant 0 : index
    %c0_7 = arith.constant 0 : index
    %c0_8 = arith.constant 0 : index
    %8 = vector.load %arg4[%c0_6, %c0_7, %c0_8] : memref<1x128x32xf32, #tpu.memory_space<vmem>>, vector<1x128x32xf32>
    %9 = vector.shape_cast %8 : vector<1x128x32xf32> to vector<128x32xf32>
    %cst_9 = arith.constant dense<0.000000e+00> : vector<8x32xf32>
    %10 = tpu.matmul %4, %9, %cst_9 {dimension_numbers = #tpu.dot_dimension_numbers<[1], [0], [0], [1], [0, 0, 1, 1], [], []>} : vector<8x128xf32>, vector<128x32xf32>, vector<8x32xf32> -> vector<8x32xf32>
    %c0_10 = arith.constant 0 : index
    %c0_11 = arith.constant 0 : index
    %c0_12 = arith.constant 0 : index
    %11 = vector.load %arg5[%c0_10, %c0_11, %c0_12] : memref<1x128x32xf32, #tpu.memory_space<vmem>>, vector<1x128x32xf32>
    %12 = vector.shape_cast %11 : vector<1x128x32xf32> to vector<128x32xf32>
    %cst_13 = arith.constant dense<0.000000e+00> : vector<8x32xf32>
    %13 = tpu.matmul %4, %12, %cst_13 {dimension_numbers = #tpu.dot_dimension_numbers<[1], [0], [0], [1], [0, 0, 1, 1], [], []>} : vector<8x128xf32>, vector<128x32xf32>, vector<8x32xf32> -> vector<8x32xf32>
    %cst_14 = arith.constant dense<0.000000e+00> : vector<8x8xf32>
    %14 = tpu.matmul %7, %10, %cst_14 {dimension_numbers = #tpu.dot_dimension_numbers<[1], [1], [0], [0], [0, 0, 1, 0], [], []>} : vector<8x32xf32>, vector<8x32xf32>, vector<8x8xf32> -> vector<8x8xf32>
    %cst_15 = arith.constant 0.353553385 : f32
    %15 = vector.broadcast %cst_15 : f32 to vector<8x8xf32>
    %16 = arith.mulf %14, %15 : vector<8x8xf32>
    %cst_16 = arith.constant dense<0xFF800000> : vector<8xf32>
    %17 = vector.multi_reduction <maximumf>, %16, %cst_16 [1] : vector<8x8xf32> to vector<8xf32>
    %18 = vector.shape_cast %17 : vector<8xf32> to vector<8x1xf32>
    %19 = vector.broadcast %18 : vector<8x1xf32> to vector<8x8xf32>
    %20 = arith.subf %16, %19 : vector<8x8xf32>
    %21 = math.exp %20 : vector<8x8xf32>
    %cst_17 = arith.constant dense<0.000000e+00> : vector<8xf32>
    %22 = vector.multi_reduction <add>, %21, %cst_17 [1] : vector<8x8xf32> to vector<8xf32>
    %23 = vector.shape_cast %22 : vector<8xf32> to vector<8x1xf32>
    %24 = tpu.reciprocal %23 : vector<8x1xf32> -> vector<8x1xf32>
    %25 = vector.broadcast %24 : vector<8x1xf32> to vector<8x8xf32>
    %26 = arith.mulf %21, %25 : vector<8x8xf32>
    %cst_18 = arith.constant dense<0.000000e+00> : vector<8x32xf32>
    %27 = tpu.matmul %26, %13, %cst_18 {dimension_numbers = #tpu.dot_dimension_numbers<[1], [0], [0], [1], [0, 0, 1, 1], [], []>} : vector<8x8xf32>, vector<8x32xf32>, vector<8x32xf32> -> vector<8x32xf32>
    %c0_19 = arith.constant 0 : index
    %c0_20 = arith.constant 0 : index
    %28 = vector.load %arg9[%c0_19, %c0_20] : memref<8x128xf32, #tpu.memory_space<vmem>>, vector<8x128xf32>
    %c0_21 = arith.constant 0 : index
    %c0_22 = arith.constant 0 : index
    %c0_23 = arith.constant 0 : index
    %29 = vector.load %arg6[%c0_21, %c0_22, %c0_23] : memref<1x32x128xf32, #tpu.memory_space<vmem>>, vector<1x32x128xf32>
    %30 = vector.shape_cast %29 : vector<1x32x128xf32> to vector<32x128xf32>
    %cst_24 = arith.constant dense<0.000000e+00> : vector<8x128xf32>
    %31 = tpu.matmul %27, %30, %cst_24 {dimension_numbers = #tpu.dot_dimension_numbers<[1], [0], [0], [1], [0, 0, 1, 1], [], []>} : vector<8x32xf32>, vector<32x128xf32>, vector<8x128xf32> -> vector<8x128xf32>
    %32 = arith.addf %28, %31 : vector<8x128xf32>
    %c0_25 = arith.constant 0 : index
    %c0_26 = arith.constant 0 : index
    %33 = vector.load %arg9[%c0_25, %c0_26] : memref<8x128xf32, #tpu.memory_space<vmem>>, vector<8x128xf32>
    tpu.vector_store %arg9[%c0_25, %c0_26], %32 {strides = array<i32>} : memref<8x128xf32, #tpu.memory_space<vmem>>, vector<8x128xf32>,
    %c3_i32 = arith.constant 3 : i32
    %34 = arith.cmpi eq, %arg1, %c3_i32 : i32
    %35 = arith.extui %34 : i1 to i32
    %c0_i32_27 = arith.constant 0 : i32
    %36 = arith.cmpi ne, %35, %c0_i32_27 : i32
    scf.if %36 {
      %c0_28 = arith.constant 0 : index
      %c0_29 = arith.constant 0 : index
      %37 = vector.load %arg9[%c0_28, %c0_29] : memref<8x128xf32, #tpu.memory_space<vmem>>, vector<8x128xf32>
      %c0_30 = arith.constant 0 : index
      %c0_31 = arith.constant 0 : index
      %38 = vector.load %arg7[%c0_30, %c0_31] : memref<1x128xf32, #tpu.memory_space<vmem>>, vector<1x128xf32>
      %39 = vector.broadcast %38 : vector<1x128xf32> to vector<8x128xf32>
      %40 = arith.addf %37, %39 : vector<8x128xf32>
      %c0_32 = arith.constant 0 : index
      %c0_33 = arith.constant 0 : index
      %c0_34 = arith.constant 0 : index
      %41 = vector.load %arg8[%c0_32, %c0_33, %c0_34] : memref<1x8x128xf32, #tpu.memory_space<vmem>>, vector<1x8x128xf32>
      %42 = vector.shape_cast %41 : vector<1x8x128xf32> to vector<8x128xf32>
      %43 = vector.shape_cast %40 : vector<8x128xf32> to vector<1x8x128xf32>
      tpu.vector_store %arg8[%c0_32, %c0_33, %c0_34], %43 {strides = array<i32>} : memref<1x8x128xf32, #tpu.memory_space<vmem>>, vector<1x8x128xf32>,
    } else {
    }
    return
  }
  func.func @transform_0(%arg0: i32, %arg1: i32) -> (i32, i32, i32) {
    %c0_i32 = arith.constant 0 : i32
    %c0_i32_0 = arith.constant 0 : i32
    %c0_i32_1 = arith.constant 0 : i32
    return %arg0, %c0_i32, %c0_i32_0 : i32, i32, i32
  }
  func.func @transform_1(%arg0: i32, %arg1: i32) -> (i32, i32, i32) {
    %c0_i32 = arith.constant 0 : i32
    %c0_i32_0 = arith.constant 0 : i32
    %c0_i32_1 = arith.constant 0 : i32
    return %arg1, %c0_i32, %c0_i32_0 : i32, i32, i32
  }
  func.func @transform_2(%arg0: i32, %arg1: i32) -> (i32, i32, i32) {
    %c0_i32 = arith.constant 0 : i32
    %c0_i32_0 = arith.constant 0 : i32
    %c0_i32_1 = arith.constant 0 : i32
    return %arg1, %c0_i32, %c0_i32_0 : i32, i32, i32
  }
  func.func @transform_3(%arg0: i32, %arg1: i32) -> (i32, i32, i32) {
    %c0_i32 = arith.constant 0 : i32
    %c0_i32_0 = arith.constant 0 : i32
    %c0_i32_1 = arith.constant 0 : i32
    return %arg1, %c0_i32, %c0_i32_0 : i32, i32, i32
  }
  func.func @transform_4(%arg0: i32, %arg1: i32) -> (i32, i32, i32) {
    %c0_i32 = arith.constant 0 : i32
    %c0_i32_0 = arith.constant 0 : i32
    %c0_i32_1 = arith.constant 0 : i32
    return %arg1, %c0_i32, %c0_i32_0 : i32, i32, i32
  }
  func.func @transform_5(%arg0: i32, %arg1: i32) -> (i32, i32) {
    %c0_i32 = arith.constant 0 : i32
    %c0_i32_0 = arith.constant 0 : i32
    %c0_i32_1 = arith.constant 0 : i32
    return %c0_i32, %c0_i32_0 : i32, i32
  }
  func.func @transform_6(%arg0: i32, %arg1: i32) -> (i32, i32, i32) {
    %c0_i32 = arith.constant 0 : i32
    %c0_i32_0 = arith.constant 0 : i32
    %c0_i32_1 = arith.constant 0 : i32
    return %arg0, %c0_i32, %c0_i32_0 : i32, i32, i32
  }
}

</mosaic_0001>

<bundles_post_ra>
// kernel: fractal_mhsa.1
= control target key start
LH: loop header
LB: loop body
LE: loop exit
PB: predicated region body
PF: predicated region fallthrough
CT: control target
= control target key end

     0   :  { %s1158_s0 = inlined_call_operand.vmem [shape: f32[2,8,128], index: 0, kind: input, shape index: {}]   ;;  %s1159_s1 = inlined_call_operand.vmem [shape: f32[4,128,32], index: 1, kind: input, shape index: {}]   ;;  %s1160_s2 = inlined_call_operand.vmem [shape: f32[4,128,32], index: 2, kind: input, shape index: {}]   ;;  %s1161_s3 = inlined_call_operand.vmem [shape: f32[4,128,32], index: 3, kind: input, shape index: {}]   ;;  %s1162_s4 = inlined_call_operand.vmem [shape: f32[4,32,128], index: 4, kind: input, shape index: {}]   ;;  %s1163_s5 = inlined_call_operand.vmem [shape: f32[1,128], index: 5, kind: input, shape index: {}]   ;;  %s1164_s6 = inlined_call_operand.hbm [shape: f32[2,8,128], index: 6, kind: output, shape index: {}]  }
   0x1   :  { %1170 = sst [smem:[#allocation12_spill]] %s1158_s0 }
   0x2   :  { %11 = vsyncpa [#allocation4], 0 }
   0x3   :  { %13 = vsyncpa [#allocation4 + $0x1], 0  ;;  %s942_s21 = smov 0   ;;  %s944_s22 = smov 0  }
   0x4   :  { %s946_s23 = smov 0   ;;  %s948_s24 = smov 0  }
   0x5   :  { %s950_s25 = smov 0   ;;  %s952_s26 = smov 0  }
   0x6   :  { %s954_s27 = smov 0   ;;  %s956_s28 = smov 0  }
   0x7 LB: > { %1171 = sst [smem:[#allocation6_spill]] %s884_s23  ;;  %s704_s29 = sadd.s32 4294967295, %s904_s28   ;;  %s904_s28 = sphi %s956_s28, %s19_s28   ;;  %s900_s27 = sphi %s954_s27, %s1186_s27   ;;  %s896_s26 = sphi %s952_s26, %s1185_s26   ;;  %s892_s25 = sphi %s950_s25, %s1184_s25   ;;  %s888_s24 = sphi %s948_s24, %s1183_s24   ;;  %s884_s23 = sphi %s946_s23, %s1182_s23   ;;  %s880_s22 = sphi %s944_s22, %s1188_s22   ;;  %s876_s21 = sphi %s942_s21, %s1187_s21  }
   0x8   : > { %1172 = sst [smem:[#allocation7_spill]] %s896_s26  ;;  %s705_s30 = sadd.s32 4294967294, %s904_s28  }
   0x9   : > { %1173 = sst [smem:[#allocation8_spill]] %s900_s27  ;;  %s28_s7 = sadd.s32 1, %s896_s26 }
   0xa   : > { %p29_p0 = scmp.ge.s32.totalorder %s28_s7, 4  ;;  %s31_s8 = sadd.s32 1, %s900_s27 }
   0xb   : > { %p199_p1 = scmp.ne.s32.totalorder %s884_s23, %s880_s22  ;;  %p200_p2 = scmp.eq.s32.totalorder %s704_s29, 7 }
   0xc   : > { %s1190_s7 = smov (%p29_p0, %s28_s7), 0  ;;  %s1192_s8 = smov (!%p29_p0, %s31_s8), %s900_s27 }
   0xd   : > { %1174 = sst [smem:[#allocation9_spill]] %s1190_s7  ;;  %p991_p3 = por %p200_p2, %p199_p1 }
   0xe   : > { %p205_p4 = scmp.ne.s32.totalorder %s880_s22, %s876_s21  ;;  %p33_p5 = scmp.ge.s32.totalorder %s1192_s8, 2 }
   0xf   : > { %p206_p6 = scmp.eq.s32.totalorder %s705_s30, 7  ;;  %p708_p7 = scmp.ge.s32.totalorder %s904_s28, 1 }
  0x10   : > { %p266_p8 = scmp.lt.s32.totalorder %s904_s28, 9  ;;  %s1194_s8 = smov (%p33_p5, %s1192_s8), 0 }
  0x11   : > { %1176 = sst [smem:[#allocation10_spill]] %s1194_s8  ;;  %p1001_p9 = por %p206_p6, %p205_p4 }
  0x12   : > { %p267_p10 = pnand %p708_p7, %p266_p8  ;;  %s186_s11 = ssub.s32 %s900_s27, %s1194_s8 }
  0x13   : > { %s189_s12 = sadd.s32 1, %s884_s23  ;;  %p187_p11 = scmp.eq.s32.totalorder %s186_s11, 0 }
  0x14   : > { %270 = sbr.rel (%p267_p10) target bundleno = 885 (0x375), region = 44  ;;  %s1167_s14 = sand.u32 (!%p267_p10), 1, %s880_s22  }
  0x15   : > { %s1009_s13 = scalar_select %p187_p11, %s884_s23, %s189_s12  }
  0x16   : > { %p315_p12 = scmp.lt.s32.totalorder (!%p267_p10), %s892_s25, 1  ;;  %s1015_s15 = sshll.u32 (!%p267_p10), %s1167_s14, 3 }
  0x17   : > { %1178 = sst [smem:[#allocation11_spill]] %s1009_s13  ;;  %p319_p13 = scmp.lt.s32.totalorder (!%p267_p10), %s888_s24, 3 }
  0x18   : > { %s1179_s0 = sld [smem:[#allocation12_spill]] (!%p267_p10)  ;;  %p719_p0 = scmp.ne.s32.totalorder (!%p267_p10), %s888_s24, 0 }
  0x19   : > { %s316_s16 = scalar_select %p315_p12, %s892_s25, 1 }
  0x1a   : > { %s320_s17 = scalar_select %p319_p13, %s888_s24, 3 }
  0x1b   : > { %s710_s18 = sshll.u32 %s316_s16, 3  ;;  %342 = sbr.rel (%p719_p0) target bundleno = 34 (0x22), region = 48 }
  0x1c   : > { %s729_s30 = sshll.u32 %s320_s17, 7  ;;  %s732_s23 = sshll.u32 %s320_s17, 5 }
  0x1d   : > { %s1028_s8 = scalar_lea.vmem %s1159_s1, %s729_s30  ;;  %s1033_s14 = scalar_lea.vmem %s1160_s2, %s729_s30 }
  0x1e   : > { %s1023_s29 = scalar_lea.vmem %s1179_s0, %s710_s18  ;;  %s1038_s16 = scalar_lea.vmem %s1161_s3, %s729_s30 }
  0x1f   : > { %s1043_s20 = scalar_lea.vmem %s1162_s4, %s732_s23  ;;  %s314_s0 = scalar_lea.vmem [#allocation3], %s1015_s15 }
  0x20   : > { %v906_v0 = vmov 0.0  }
  0x21   : > { %343 = vst [vmem:[#allocation2] sm:$0xff] %v906_v0 }
  0x22 PF: > { %v396_v1 = vld [vmem:[%s1033_s14 + $0x78] sm:$0xff]  ;;  %v395_v2 = vld [vmem:[%s1033_s14 + $0x70] sm:$0xff]  ;;  %v394_v5 = vld [vmem:[%s1033_s14 + $0x68] sm:$0xff]  ;;  %vm453_vm0 = vcmask 261120   ;;  %vm481_vm1 = vcmask 64512   ;;  %p724_p1 = scmp.ne.s32.totalorder %s888_s24, 3 }
  0x23   : > { %v360_v3 = vld [vmem:[%s1028_s8 + $0x78] sm:$0xff]  ;;  %397 = vmatpush.msra.mxu1 %v396_v1  ;;  %v359_v4 = vld [vmem:[%s1028_s8 + $0x70] sm:$0xff]  ;;  %v358_v6 = vld [vmem:[%s1028_s8 + $0x68] sm:$0xff] }
  0x24   : > { %361 = vmatpush.msra.mxu0 %v360_v3  ;;  %v393_v7 = vld [vmem:[%s1033_s14 + $0x60] sm:$0xff]  ;;  %v392_v9 = vld [vmem:[%s1033_s14 + $0x58] sm:$0xff]  ;;  %v391_v11 = vld [vmem:[%s1033_s14 + $0x50] sm:$0xff] }
  0x25   : > { %398 = vmatpush.msra.mxu1 %v395_v2  ;;  %v357_v8 = vld [vmem:[%s1028_s8 + $0x60] sm:$0xff]  ;;  %v356_v10 = vld [vmem:[%s1028_s8 + $0x58] sm:$0xff]  ;;  %v355_v12 = vld [vmem:[%s1028_s8 + $0x50] sm:$0xff] }
  0x26   : > { %362 = vmatpush.msra.mxu0 %v359_v4  ;;  %v390_v13 = vld [vmem:[%s1033_s14 + $0x48] sm:$0xff]  ;;  %v389_v15 = vld [vmem:[%s1033_s14 + $0x40] sm:$0xff]  ;;  %v388_v17 = vld [vmem:[%s1033_s14 + $0x38] sm:$0xff] }
  0x27   : > { %399 = vmatpush.msra.mxu1 %v394_v5  ;;  %v354_v14 = vld [vmem:[%s1028_s8 + $0x48] sm:$0xff]  ;;  %v353_v16 = vld [vmem:[%s1028_s8 + $0x40] sm:$0xff]  ;;  %v352_v18 = vld [vmem:[%s1028_s8 + $0x38] sm:$0xff] }
  0x28   : > { %363 = vmatpush.msra.mxu0 %v358_v6  ;;  %v387_v19 = vld [vmem:[%s1033_s14 + $0x30] sm:$0xff]  ;;  %v386_v21 = vld [vmem:[%s1033_s14 + $0x28] sm:$0xff]  ;;  %v385_v23 = vld [vmem:[%s1033_s14 + $0x20] sm:$0xff] }
  0x29   : > { %400 = vmatpush.msra.mxu1 %v393_v7  ;;  %v351_v20 = vld [vmem:[%s1028_s8 + $0x30] sm:$0xff]  ;;  %v350_v22 = vld [vmem:[%s1028_s8 + $0x28] sm:$0xff]  ;;  %v349_v24 = vld [vmem:[%s1028_s8 + $0x20] sm:$0xff] }
  0x2a   : > { %364 = vmatpush.msra.mxu0 %v357_v8  ;;  %v384_v25 = vld [vmem:[%s1033_s14 + $0x18] sm:$0xff]  ;;  %v383_v27 = vld [vmem:[%s1033_s14 + $0x10] sm:$0xff]  ;;  %v382_v29 = vld [vmem:[%s1033_s14 + $0x8] sm:$0xff] }
  0x2b   : > { %401 = vmatpush.msra.mxu1 %v392_v9  ;;  %v348_v26 = vld [vmem:[%s1028_s8 + $0x18] sm:$0xff]  ;;  %v347_v28 = vld [vmem:[%s1028_s8 + $0x10] sm:$0xff]  ;;  %v346_v30 = vld [vmem:[%s1028_s8 + $0x8] sm:$0xff] }
  0x2c   : > { %365 = vmatpush.msra.mxu0 %v356_v10  ;;  %v381_v31 = vld [vmem:[%s1033_s14] sm:$0xff]  ;;  %v432_v36 = vld [vmem:[%s1038_s16 + $0x78] sm:$0xff]  ;;  %v431_v37 = vld [vmem:[%s1038_s16 + $0x70] sm:$0xff] }
  0x2d   : > { %402 = vmatpush.msra.mxu1 %v391_v11  ;;  %v345_v32 = vld [vmem:[%s1028_s8] sm:$0xff]  ;;  %433 = vmatpush.msra.mxu2 %v432_v36  ;;  %v430_v38 = vld [vmem:[%s1038_s16 + $0x68] sm:$0xff]  ;;  %v428_v40 = vld [vmem:[%s1038_s16 + $0x58] sm:$0xff] }
  0x2e   : > { %366 = vmatpush.msra.mxu0 %v355_v12  ;;  %v344_v33 = vld [vmem:[%s1023_s29] sm:$0xff]  ;;  %v427_v41 = vld [vmem:[%s1038_s16 + $0x50] sm:$0xff]  ;;  %v426_v42 = vld [vmem:[%s1038_s16 + $0x48] sm:$0xff] }
  0x2f   : > { %403 = vmatpush.msra.mxu1 %v390_v13  ;;  %434 = vmatpush.msra.mxu2 %v431_v37  ;;  %v429_v39 = vld [vmem:[%s1038_s16 + $0x60] sm:$0xff]  ;;  %v424_v44 = vld [vmem:[%s1038_s16 + $0x38] sm:$0xff]  ;;  %v423_v45 = vld [vmem:[%s1038_s16 + $0x30] sm:$0xff] }
  0x30   : > { %367 = vmatpush.msra.mxu0 %v354_v14  ;;  %v425_v43 = vld [vmem:[%s1038_s16 + $0x40] sm:$0xff]  ;;  %v422_v46 = vld [vmem:[%s1038_s16 + $0x28] sm:$0xff]  ;;  %v420_v51 = vld [vmem:[%s1038_s16 + $0x18] sm:$0xff] }
  0x31   : > { %404 = vmatpush.msra.mxu1 %v389_v15  ;;  %435 = vmatpush.msra.mxu2 %v430_v38  ;;  %v421_v47 = vld [vmem:[%s1038_s16 + $0x20] sm:$0xff]  ;;  %v419_v52 = vld [vmem:[%s1038_s16 + $0x10] sm:$0xff]  ;;  %v418_v53 = vld [vmem:[%s1038_s16 + $0x8] sm:$0xff] }
  0x32   : > { %368 = vmatpush.msra.mxu0 %v353_v16  ;;  %v417_v54 = vld [vmem:[%s1038_s16] sm:$0xff]  ;;  %v533_v61 = vld [vmem:[%s1043_s20 + $0x18] sm:$0xff]  ;;  %v532_v62 = vld [vmem:[%s1043_s20 + $0x10] sm:$0xff] }
  0x33   : > { %405 = vmatpush.msra.mxu1 %v388_v17  ;;  %436 = vmatpush.msra.mxu2 %v429_v39  ;;  %v531_v63 = vld [vmem:[%s1043_s20 + $0x8] sm:$0xff]  ;;  %v530_v0 = vld [vmem:[%s1043_s20] sm:$0xff] }
  0x34   : > { %369 = vmatpush.msra.mxu0 %v352_v18  ;;  %v529_v14 = vld [vmem:[#allocation2] sm:$0xff] }
  0x35   : > { %406 = vmatpush.msra.mxu1 %v387_v19  ;;  %437 = vmatpush.msra.mxu2 %v428_v40 }
  0x36   : > { %370 = vmatpush.msra.mxu0 %v351_v20 }
  0x37   : > { %407 = vmatpush.msra.mxu1 %v386_v21  ;;  %438 = vmatpush.msra.mxu2 %v427_v41 }
  0x38   : > { %371 = vmatpush.msra.mxu0 %v350_v22 }
  0x39   : > { %408 = vmatpush.msra.mxu1 %v385_v23  ;;  %439 = vmatpush.msra.mxu2 %v426_v42 }
  0x3a   : > { %372 = vmatpush.msra.mxu0 %v349_v24 }
  0x3b   : > { %409 = vmatpush.msra.mxu1 %v384_v25  ;;  %440 = vmatpush.msra.mxu2 %v425_v43 }
  0x3c   : > { %373 = vmatpush.msra.mxu0 %v348_v26 }
  0x3d   : > { %410 = vmatpush.msra.mxu1 %v383_v27  ;;  %441 = vmatpush.msra.mxu2 %v424_v44 }
  0x3e   : > { %374 = vmatpush.msra.mxu0 %v347_v28 }
  0x3f   : > { %411 = vmatpush.msra.mxu1 %v382_v29  ;;  %442 = vmatpush.msra.mxu2 %v423_v45 }
  0x40   : > { %375 = vmatpush.msra.mxu0 %v346_v30 }
  0x41   : > { %412 = vmatpush.msra.mxu1 %v381_v31  ;;  %443 = vmatpush.msra.mxu2 %v422_v46 }
  0x42   : > { %376 = vmatpush.msra.mxu0 %v345_v32  ;;  %413 = vmatmul.f32.vlgmr.msra.gmra.mxu1 %v344_v33 }
  0x43   : > { %377 = vmatmul.f32.vlgmr.msra.gmra.mxu0 %v344_v33  ;;  %444 = vmatpush.msra.mxu2 %v421_v47 }
  0x45   : > { %445 = vmatpush.msra.mxu2 %v420_v51 }
  0x47   : > { %446 = vmatpush.msra.mxu2 %v419_v52 }
  0x49   : > { %447 = vmatpush.msra.mxu2 %v418_v53 }
  0x4b   : > { %448 = vmatpush.msra.mxu2 %v417_v54 }
  0x4c   : > { %449 = vmatmul.f32.vlgmr.msra.gmra.mxu2 %v344_v33 }
  0xbf   : > { %v414_v34 = vpop.f32.mrf.mxu1 }
  0xc0   : > { %720 = vmatpush.xpose.msk.msra.mxu3 %vm453_vm0, %v414_v34  ;;  %v378_v35 = vpop.f32.mrf.mxu0 }
  0xc3   : > { %721 = vmatmul.msk.f32.vlgmr.msra.gmra.mxu3 %vm453_vm0, %v378_v35 }
  0xcf   : > { %v450_v60 = vpop.f32.mrf.mxu2 }
  0xd0   : > { %524 = vmatpush.msrb.mxu3 %v450_v60 }
  0xd2   : > { %549 = vmatpush.msra.mxu3 %v533_v61 }
  0xd4   : > { %550 = vmatpush.msra.mxu3 %v532_v62 }
  0xd6   : > { %551 = vmatpush.msra.mxu3 %v531_v63 }
  0xd8   : > { %552 = vmatpush.msra.mxu3 %v530_v0 }
 0x146   : > { %v477_v48 = vpop.f32.mrf.mxu3 }
 0x147   : > { %v480_v49 = vmul.f32 0.35355338, %v477_v48 }
 0x149   : > { %v482_v50 = vsel %vm481_vm1, %v480_v49, -inf }
 0x14a   : > { %483 = vmax.xlane.f32.xlu0 %v482_v50 }
 0x1bd   : > { %v484_v55 = vpop.xlane.xlu0 %483 }
 0x1be   : > { %v485_v56 = vsub.f32 %v480_v49, %v484_v55 }
 0x1c0   : > { %v486_v57 = vmul.f32 1.442695, %v485_v56 }
 0x1c2   : > { %805 = vpow2.f32 %v486_v57 }
 0x1c8   : > { %v806_v58 = vpop.eup %805 }
 0x1c9   : > { %v488_v59 = vsel %vm481_vm1, %v806_v58, 0.0 }
 0x1ca   : > { %489 = vadd.xlane.f32.xlu0 %v488_v59 }
 0x23d   : > { %v490_v1 = vpop.xlane.xlu0 %489 }
 0x23e   : > { %807 = vrcp.f32 %v490_v1  ;;  %v502_v5 = vand.u32 2147483648, %v490_v1  ;;  %v500_v7 = vand.u32 2147483647, %v490_v1  ;;  %vm496_vm3 = vweird.f32 %v490_v1 }
 0x240   : > { %v503_v9 = vor.u32 1.1754944e-38, %v502_v5  ;;  %vm501_vm5 = vcmp.eq.f32.partialorder %v500_v7, 8.507059e+37 }
 0x244   : > { %v808_v2 = vpop.eup %807 }
 0x245   : > { %v492_v3 = vmul.f32 %v808_v2, %v490_v1  ;;  %vm497_vm2 = vweird.f32 %v808_v2 }
 0x246   : > { %vm498_vm4 = vmor %vm496_vm3, %vm497_vm2 }
 0x247   : > { %v493_v4 = vsub.f32 1.0, %v492_v3 }
 0x249   : > { %v494_v6 = vmul.f32 %v808_v2, %v493_v4 }
 0x24b   : > { %v495_v8 = vadd.f32 %v808_v2, %v494_v6 }
 0x24d   : > { %v499_v10 = vsel %vm498_vm4, %v808_v2, %v495_v8 }
 0x24e   : > { %v504_v11 = vsel %vm501_vm5, %v503_v9, %v499_v10 }
 0x24f   : > { %v505_v12 = vmul.f32 %v806_v58, %v504_v11 }
 0x251   : > { %722 = vmatmul.msk.f32.vlgmr.msrb.gmra.mxu3 %vm481_vm1, %v505_v12 }
 0x2d4   : > { %v526_v13 = vpop.f32.mrf.mxu3 }
 0x2d5   : > { %723 = vmatmul.msk.f32.vlgmr.msra.gmra.mxu3 %vm453_vm0, %v526_v13 }
 0x357   : > { %562 = sbr.rel (%p724_p1) target bundleno = 870 (0x366), region = 52 }
 0x358   : > { %v554_v15 = vpop.f32.mrf.mxu3 }
 0x359   : > { %v557_v16 = vadd.f32 %v554_v15, %v529_v14 }
 0x35b   : > { %558 = vst [vmem:[#allocation2] sm:$0xff] %v557_v16 }
 0x35c   : > { %v809_v18 = vld [vmem:[%s1163_s5] ss:$0 sm:$0xff] }
 0x362   : > { %v563_v17 = vld [vmem:[#allocation2] sm:$0xff] }
 0x363   : > { %v568_v19 = vadd.f32 %v809_v18, %v563_v17 }
 0x365   : > { %569 = vst [vmem:[%s314_s0] sm:$0xff] %v568_v19 }
 0x366 PF: > { %s726_s27 = sshll.u32 %s892_s25, 3  ;;  %s583_s13 = sshll.u32 %s314_s0, 4  ;;  %s584_s13 = int_to_ptr.vmem [resolvable:$true] %s583_s13 }
 0x367   : > { %s581_s24 = scalar_lea.hbm %s1164_s6, %s726_s27  ;;  %s1180_s17 = sand.u32 1, %s880_s22  }
 0x368   : > { %s585_s14 = sshll.u32 %s581_s24, 4  ;;  %s571_s29 = scalar_lea.sflag [#allocation4], %s1180_s17  ;;  %s586_s14 = int_to_ptr.hbm [resolvable:$true] %s585_s14 }
 0x369   : > { %s824_s30 = sshra.s32 %s586_s14, 4  ;;  %s830_s16 = scalar_lea.hbm %s1164_s6, 16  ;;  %s825_s30 = int_to_ptr.hbm [resolvable:$true] %s824_s30 }
 0x36a   : > { %s826_s11 = scalar_lea.hbm %s825_s30, 8  ;;  %p831_p6 = scmp.lt.s32.totalorder %s825_s30, %s1164_s6 }
 0x36b   : > { %p827_p2 = scmp.ne.s32.totalorder %s825_s30, %s826_s11  ;;  %p832_p7 = scmp.lt.s32.totalorder %s830_s16, %s826_s11 }
 0x36d   : > { %p828_p4 = pnand %p827_p2, %p991_p3  ;;  %p833_p8 = por %p832_p7, %p831_p6 }
 0x36f   : > { %p829_p5 = pneg %p828_p4 }
 0x371   : > { %p834_p10 = pnand %p833_p8, %p829_p5 }
 0x373   : > { %837 = shalt.err (!%p834_p10)
}
 0x374   : > { %733 = dma.vmem_to_hbm [thread:$0]  (%p991_p3), %s584_s13, 128, %s586_s14, %s571_s29  }
 0x375 PF: > { %p739_p11 = scmp.ge.s32.totalorder %s904_s28, 2  ;;  %s597_s0 = sand.u32 1, %s876_s21  }
 0x376   : > { %s598_s15 = scalar_lea.sflag [#allocation4], %s597_s0 }
 0x377   : > { %p736_p12 = pnand %p739_p11, %p1001_p9 }
 0x379   : > { %p737_p13 = pneg %p736_p12 }
 0x37b   : > { %871 = dma.done.wait (%p737_p13), %s598_s15, 128  }
 0x37c   : > { %873 = vsyncadd (%p737_p13), %s598_s15, 4294967168  ;;  %s19_s28 = sadd.s32 1, %s904_s28   ;;  %s1181_s20 = sld [smem:[#allocation6_spill]] }
 0x37d   : > { %p16_p0 = scmp.ge.s32.totalorder %s19_s28, 10   ;;  %s1182_s23 = sld [smem:[#allocation11_spill]] }
 0x37e   : > { %s1183_s24 = sld [smem:[#allocation7_spill]]  ;;  %s1187_s21 = smov %s880_s22 }
 0x37f   : > { %s1184_s25 = sld [smem:[#allocation8_spill]]  ;;  %18 = sbr.rel (!%p16_p0) target bundleno = 7 (0x7), region = 99 }
 0x380   : > { %s1185_s26 = sld [smem:[#allocation9_spill]] }
 0x381   : > { %s1186_s27 = sld [smem:[#allocation10_spill]] }
 0x382   : > { %s1188_s22 = smov %s1181_s20 }
 0x384   :  { %604 = vsyncpa [#allocation4], 1 }
 0x385   :  { %606 = vsyncpa [#allocation4 + $0x1], 1 }

</bundles_post_ra>
